<compile_context>
chip_gen: v5e
topology: v5e:2x2
jax: 0.10.0
libtpu: 0.0.40
codegen_flags: <defaults>
</compile_context>

<pallas_src>
import jax
import jax.numpy as jnp
from jax.experimental import pallas as pl
from jax.experimental.pallas import tpu as pltpu

LOGIT_PAD = 128  # lane-dense padded width of the fused taskA||taskB logits


def mts_kernel(h_ref, m_ref, wp_ref, w1_ref, w2_ref, vec_ref,
               emb_ref, logit_ref, acc_sum, acc_cnt):
    """Per-tile masked-sum accumulation + fused projection/LN/heads epilogue."""
    k = pl.program_id(1)

    # ---- init accumulators at the start of each batch tile's reduction ----
    @pl.when(k == 0)
    def _():
        acc_sum[...] = jnp.zeros_like(acc_sum)
        acc_cnt[...] = jnp.zeros_like(acc_cnt)

    # ---- masked-sum accumulation for this (batch, seq) tile (f32 accum) ----
    h = h_ref[...].astype(jnp.float32)                      # (tb, ts, H)
    m = m_ref[...].astype(jnp.float32)                      # (tb, ts)
    acc_sum[...] += jnp.sum(h * m[:, :, None], axis=1)      # (tb, H)
    acc_cnt[...] += jnp.sum(m, axis=1, keepdims=True)       # (tb, 1)

    # ---- finalize: projection -> LayerNorm -> L2 normalize -> fused heads ----
    @pl.when(k == pl.num_programs(1) - 1)
    def _():
        E = emb_ref.shape[1]
        H2 = w1_ref.shape[1]
        LP = logit_ref.shape[1]

        b_proj = vec_ref[0:1, 0:E]
        gamma = vec_ref[1:2, 0:E]
        beta = vec_ref[2:3, 0:E]
        b1 = vec_ref[3:4, 0:H2]
        b2 = vec_ref[4:5, 0:LP]

        # clamp like SentenceTransformer mean pooling (avoids NaN on all-pad rows)
        pooled = acc_sum[...] / jnp.maximum(acc_cnt[...], 1e-9)   # (tb, H)

        # projection: Linear(transformer_dim -> embedding_dim)
        x = jnp.dot(pooled, wp_ref[...],
                    preferred_element_type=jnp.float32) + b_proj  # (tb, E)

        # LayerNorm(embedding_dim), eps = 1e-5
        mu = jnp.mean(x, axis=-1, keepdims=True)
        var = jnp.mean((x - mu) * (x - mu), axis=-1, keepdims=True)
        x = (x - mu) * jax.lax.rsqrt(var + 1e-5)
        x = x * gamma + beta

        # F.normalize(p=2, dim=1), eps = 1e-12
        norm = jnp.sqrt(jnp.sum(x * x, axis=-1, keepdims=True))
        x = x / jnp.maximum(norm, 1e-12)
        emb_ref[...] = x.astype(emb_ref.dtype)

        # fused task A/B heads: Linear -> ReLU -> (Dropout=identity) -> Linear
        # layer 1: x @ [wa1 | wb1];  layer 2: block-diagonal [wa2 0; 0 wb2]
        # padded to LOGIT_PAD lanes so the logits store is lane-dense.
        h1 = jnp.dot(x, w1_ref[...], preferred_element_type=jnp.float32) + b1
        h1 = jnp.maximum(h1, 0.0)
        logit_ref[...] = (jnp.dot(h1, w2_ref[...],
                                  preferred_element_type=jnp.float32)
                          + b2).astype(logit_ref.dtype)


def pack_params(params, logit_pad=LOGIT_PAD):
    """Fuse the two task heads and pack the small vectors into one slab."""
    E = params["w_proj"].shape[1]
    half = params["wa1"].shape[1]
    C = params["wa2"].shape[1]
    H2 = 2 * half
    W = max(E, H2, logit_pad)
    f32 = jnp.float32

    w_proj = params["w_proj"].astype(f32)

    # layer-1 heads fused column-wise: x @ [wa1 | wb1]
    w1 = jnp.concatenate([params["wa1"], params["wb1"]], axis=1).astype(f32)

    # layer-2 heads fused block-diagonally, padded to a lane-dense width
    w2 = jnp.zeros((H2, logit_pad), f32)
    w2 = w2.at[:half, :C].set(params["wa2"].astype(f32))
    w2 = w2.at[half:, C:2 * C].set(params["wb2"].astype(f32))

    def row(v, width=W):
        v = v.astype(f32).reshape(1, -1)
        return jnp.pad(v, ((0, 0), (0, width - v.shape[1])))

    vec = jnp.concatenate([
        row(params["b_proj"]),
        row(params["ln_gamma"]),
        row(params["ln_beta"]),
        row(jnp.concatenate([params["ba1"], params["bb1"]], axis=1)),
        row(jnp.concatenate([params["ba2"], params["bb2"]], axis=1)),
    ], axis=0)                                              # (5, W)
    return w_proj, w1, w2, vec, C


def _choose_tiles(B, S, H, itemsize, budget_bytes=8 << 20):
    """Pick (tb, ts) that divide (B, S), satisfy (8,128) tiling rules and keep
    one double-buffered activation tile well under v7x's 64 MiB VMEM."""
    # sequence tile: largest multiple-of-128 divisor of S, capped at 512
    if S % 128 == 0:
        ts = 128
        for c in (512, 384, 256, 128):
            if S % c == 0:
                ts = c
                break
    else:
        ts = S
    # batch tile: multiple of 8 dividing B (or B itself); prefer >= 2 tiles so
    # the "parallel" axis can be sharded over both v7x TensorCores.
    candidates = [t for t in (128, 64, 32, 16, 8) if t < B and B % t == 0]
    candidates.append(B)
    tb = None
    for t in candidates:
        if t * ts * H * itemsize <= budget_bytes:
            tb = t
            break
    if tb is None:
        tb = min(candidates)
    return tb, ts


def multitask_forward(hidden_states, attention_mask, params):
    """Pooling + projection + LayerNorm + normalize + fused heads in Pallas."""
    B, S, H = hidden_states.shape
    E = params["w_proj"].shape[1]
    w_proj, w1, w2, vec, C = pack_params(params)
    H2 = w1.shape[1]
    LP = w2.shape[1]
    W = vec.shape[1]

    # mask shipped as f32 (tiny vs hidden_states); values are exact 0/1
    mask = attention_mask.astype(jnp.float32)

    hid_isz = jnp.dtype(hidden_states.dtype).itemsize
    tb, ts = _choose_tiles(B, S, H, hid_isz)
    assert B % tb == 0 and S % ts == 0
    grid = (B // tb, S // ts)

    # VMEM budget: double-buffered activation tiles + resident weights + scratch
    tile_in = tb * ts * H * hid_isz + tb * ts * 4
    weight_bytes = (H * E + E * H2 + H2 * LP + 5 * W) * 4
    out_bytes = tb * (E + LP) * 4
    scratch_bytes = tb * (H + 128) * 4
    vmem_limit = 2 * tile_in + 2 * weight_bytes + 2 * out_bytes + scratch_bytes
    vmem_limit = int(min(max(vmem_limit + (2 << 20), 4 << 20), 48 << 20))

    cost = pl.CostEstimate(
        flops=int(2 * B * S * H + 2 * B * (H * E + E * H2 + H2 * LP)),
        transcendentals=int(2 * B),
        bytes_accessed=int(B * S * H * hid_isz + B * S * 4
                           + weight_bytes + B * (E + LP) * 4),
    )

    emb, logits = pl.pallas_call(
        mts_kernel,
        out_shape=(
            jax.ShapeDtypeStruct((B, E), jnp.float32),    # embedding
            jax.ShapeDtypeStruct((B, LP), jnp.float32),   # fused padded logits
        ),
        grid_spec=pltpu.PrefetchScalarGridSpec(
            num_scalar_prefetch=0,
            grid=grid,
            in_specs=[
                pl.BlockSpec((tb, ts, H), lambda i, k: (i, k, 0)),   # hidden
                pl.BlockSpec((tb, ts), lambda i, k: (i, k)),         # mask
                pl.BlockSpec((H, E), lambda i, k: (0, 0)),           # w_proj
                pl.BlockSpec((E, H2), lambda i, k: (0, 0)),          # fused w1
                pl.BlockSpec((H2, LP), lambda i, k: (0, 0)),         # fused w2
                pl.BlockSpec((5, W), lambda i, k: (0, 0)),           # bias slab
            ],
            out_specs=(
                pl.BlockSpec((tb, E), lambda i, k: (i, 0)),
                pl.BlockSpec((tb, LP), lambda i, k: (i, 0)),
            ),
            scratch_shapes=[
                pltpu.VMEM((tb, H), jnp.float32),   # sum_embeddings accumulator
                pltpu.VMEM((tb, 1), jnp.float32),   # sum_mask accumulator
            ],
        ),
        compiler_params=pltpu.CompilerParams(
            dimension_semantics=("parallel", "arbitrary"),
            vmem_limit_bytes=vmem_limit,
        ),
        cost_estimate=cost,
    )(hidden_states, mask, w_proj, w1, w2, vec)

    taskA_logits = logits[:, :C]
    taskB_logits = logits[:, C:2 * C]
    return emb, taskA_logits, taskB_logits


def reference_forward(hidden_states, attention_mask, params):
    """Pure-JAX reference of the same math, for a correctness check."""
    m = attention_mask.astype(jnp.float32)
    sum_emb = jnp.sum(hidden_states * m[:, :, None], axis=1)
    sum_mask = jnp.maximum(jnp.sum(m, axis=1, keepdims=True), 1e-9)
    pooled = sum_emb / sum_mask
    x = pooled @ params["w_proj"] + params["b_proj"]
    mu = jnp.mean(x, axis=-1, keepdims=True)
    var = jnp.mean((x - mu) ** 2, axis=-1, keepdims=True)
    x = (x - mu) / jnp.sqrt(var + 1e-5) * params["ln_gamma"] + params["ln_beta"]
    x = x / jnp.maximum(jnp.linalg.norm(x, axis=1, keepdims=True), 1e-12)
    ha = jnp.maximum(x @ params["wa1"] + params["ba1"], 0.0)
    la = ha @ params["wa2"] + params["ba2"]
    hb = jnp.maximum(x @ params["wb1"] + params["bb1"], 0.0)
    lb = hb @ params["wb2"] + params["bb2"]
    return x, la, lb


def make_params(key, transformer_dim, embedding_dim, num_classes=2):
    half = embedding_dim // 2
    ks = jax.random.split(key, 10)
    s = 0.05
    return {
        "w_proj":   s * jax.random.normal(ks[0], (transformer_dim, embedding_dim), jnp.float32),
        "b_proj":   s * jax.random.normal(ks[1], (1, embedding_dim), jnp.float32),
        "ln_gamma": jnp.ones((1, embedding_dim), jnp.float32),
        "ln_beta":  jnp.zeros((1, embedding_dim), jnp.float32),
        "wa1":      s * jax.random.normal(ks[2], (embedding_dim, half), jnp.float32),
        "ba1":      s * jax.random.normal(ks[3], (1, half), jnp.float32),
        "wa2":      s * jax.random.normal(ks[4], (half, num_classes), jnp.float32),
        "ba2":      s * jax.random.normal(ks[5], (1, num_classes), jnp.float32),
        "wb1":      s * jax.random.normal(ks[6], (embedding_dim, half), jnp.float32),
        "bb1":      s * jax.random.normal(ks[7], (1, half), jnp.float32),
        "wb2":      s * jax.random.normal(ks[8], (half, num_classes), jnp.float32),
        "bb2":      s * jax.random.normal(ks[9], (1, num_classes), jnp.float32),
    }


if __name__ == "__main__":
    # small shapes: batch=2, seq=8, transformer_dim=32, embedding_dim=32
    B, S, H, E = 2, 8, 32, 32
    VOCAB = 100

    key = jax.random.PRNGKey(0)
    k_tok, k_emb, k_par = jax.random.split(key, 3)

    # TODO(synk): pretrained BERT backbone has no Pallas equivalent without a
    # checkpoint; replaced by a deterministic token-embedding lookup stand-in.
    input_ids = jax.random.randint(k_tok, (B, S), 0, VOCAB)
    attention_mask = jnp.concatenate(
        [jnp.ones((B, S - 2), jnp.int32), jnp.zeros((B, 2), jnp.int32)], axis=1)
    embed_table = 0.1 * jax.random.normal(k_emb, (VOCAB, H), jnp.float32)
    hidden_f32 = embed_table[input_ids]                  # stand-in last_hidden_state

    # ship activations as bf16 across the pallas_call boundary (halves HBM
    # traffic of the only large operand); kernel upcasts per tile.
    hidden_bf16 = hidden_f32.astype(jnp.bfloat16)

    params = make_params(k_par, transformer_dim=H, embedding_dim=E)

    emb, la, lb = multitask_forward(hidden_bf16, attention_mask, params)
    jax.block_until_ready((emb, la, lb))

    # reference on the same (bf16-rounded) activations, all-f32 math
    ref_emb, ref_la, ref_lb = reference_forward(
        hidden_bf16.astype(jnp.float32), attention_mask, params)
    assert jnp.allclose(emb, ref_emb, atol=1e-4), "embedding mismatch"
    assert jnp.allclose(la, ref_la, atol=1e-4), "taskA logits mismatch"
    assert jnp.allclose(lb, ref_lb, atol=1e-4), "taskB logits mismatch"

    print("KERNEL_OK")
</pallas_src>

<mosaic_0001>
module attributes {stable_mosaic.version = 11 : i64} {
  func.func @mts_kernel(%arg0: i32, %arg1: i32, %arg2: memref<2x8x32xbf16, #tpu.memory_space<vmem>>, %arg3: memref<2x8xf32, #tpu.memory_space<vmem>>, %arg4: memref<32x32xf32, #tpu.memory_space<vmem>>, %arg5: memref<32x32xf32, #tpu.memory_space<vmem>>, %arg6: memref<32x128xf32, #tpu.memory_space<vmem>>, %arg7: memref<5x128xf32, #tpu.memory_space<vmem>>, %arg8: memref<2x32xf32, #tpu.memory_space<vmem>>, %arg9: memref<2x128xf32, #tpu.memory_space<vmem>>, %arg10: memref<2x32xf32, #tpu.memory_space<vmem>>, %arg11: memref<2x1xf32, #tpu.memory_space<vmem>>) attributes {dimension_semantics = [#tpu.dimension_semantics<parallel>, #tpu.dimension_semantics<arbitrary>], iteration_bounds = array<i64: 1, 1>, scalar_prefetch = 0 : i64, scratch_operands = 2 : i64, tpu.core_type = #tpu.core_type<tc>, window_params = [{transform_indices = @transform_0, window_bounds = array<i64: 2, 8, 32>}, {transform_indices = @transform_1, window_bounds = array<i64: 2, 8>}, {pipeline_mode = #tpu.pipeline_mode<synchronous>, transform_indices = @transform_2, window_bounds = array<i64: 32, 32>}, {pipeline_mode = #tpu.pipeline_mode<synchronous>, transform_indices = @transform_3, window_bounds = array<i64: 32, 32>}, {pipeline_mode = #tpu.pipeline_mode<synchronous>, transform_indices = @transform_4, window_bounds = array<i64: 32, 128>}, {pipeline_mode = #tpu.pipeline_mode<synchronous>, transform_indices = @transform_5, window_bounds = array<i64: 5, 128>}, {transform_indices = @transform_6, window_bounds = array<i64: 2, 32>}, {transform_indices = @transform_7, window_bounds = array<i64: 2, 128>}]} {
    %c0_i32 = arith.constant 0 : i32
    %0 = arith.cmpi eq, %arg1, %c0_i32 : i32
    %1 = arith.extui %0 : i1 to i32
    %c0_i32_0 = arith.constant 0 : i32
    %2 = arith.cmpi ne, %1, %c0_i32_0 : i32
    scf.if %2 {
      %cst_16 = arith.constant 0.000000e+00 : f32
      %21 = vector.broadcast %cst_16 : f32 to vector<2x32xf32>
      %c0_17 = arith.constant 0 : index
      %c0_18 = arith.constant 0 : index
      %22 = vector.load %arg10[%c0_17, %c0_18] : memref<2x32xf32, #tpu.memory_space<vmem>>, vector<2x32xf32>
      tpu.vector_store %arg10[%c0_17, %c0_18], %21 {strides = array<i32>} : memref<2x32xf32, #tpu.memory_space<vmem>>, vector<2x32xf32>,
      %cst_19 = arith.constant 0.000000e+00 : f32
      %23 = vector.broadcast %cst_19 : f32 to vector<2x1xf32>
      %c0_20 = arith.constant 0 : index
      %c0_21 = arith.constant 0 : index
      %24 = vector.load %arg11[%c0_20, %c0_21] : memref<2x1xf32, #tpu.memory_space<vmem>>, vector<2x1xf32>
      tpu.vector_store %arg11[%c0_20, %c0_21], %23 {strides = array<i32>} : memref<2x1xf32, #tpu.memory_space<vmem>>, vector<2x1xf32>,
    } else {
    }
    %c0 = arith.constant 0 : index
    %c0_1 = arith.constant 0 : index
    %c0_2 = arith.constant 0 : index
    %3 = vector.load %arg2[%c0, %c0_1, %c0_2] : memref<2x8x32xbf16, #tpu.memory_space<vmem>>, vector<2x8x32xbf16>
    %4 = arith.extf %3 : vector<2x8x32xbf16> to vector<2x8x32xf32>
    %c0_3 = arith.constant 0 : index
    %c0_4 = arith.constant 0 : index
    %5 = vector.load %arg3[%c0_3, %c0_4] : memref<2x8xf32, #tpu.memory_space<vmem>>, vector<2x8xf32>
    %c0_5 = arith.constant 0 : index
    %c0_6 = arith.constant 0 : index
    %6 = vector.load %arg10[%c0_5, %c0_6] : memref<2x32xf32, #tpu.memory_space<vmem>>, vector<2x32xf32>
    %7 = vector.shape_cast %5 : vector<2x8xf32> to vector<2x8x1xf32>
    %8 = vector.broadcast %7 : vector<2x8x1xf32> to vector<2x8x32xf32>
    %9 = arith.mulf %4, %8 : vector<2x8x32xf32>
    %cst = arith.constant dense<0.000000e+00> : vector<2x32xf32>
    %10 = vector.multi_reduction <add>, %9, %cst [1] : vector<2x8x32xf32> to vector<2x32xf32>
    %11 = arith.addf %6, %10 : vector<2x32xf32>
    %c0_7 = arith.constant 0 : index
    %c0_8 = arith.constant 0 : index
    %12 = vector.load %arg10[%c0_7, %c0_8] : memref<2x32xf32, #tpu.memory_space<vmem>>, vector<2x32xf32>
    tpu.vector_store %arg10[%c0_7, %c0_8], %11 {strides = array<i32>} : memref<2x32xf32, #tpu.memory_space<vmem>>, vector<2x32xf32>,
    %c0_9 = arith.constant 0 : index
    %c0_10 = arith.constant 0 : index
    %13 = vector.load %arg11[%c0_9, %c0_10] : memref<2x1xf32, #tpu.memory_space<vmem>>, vector<2x1xf32>
    %cst_11 = arith.constant dense<0.000000e+00> : vector<2xf32>
    %14 = vector.multi_reduction <add>, %5, %cst_11 [1] : vector<2x8xf32> to vector<2xf32>
    %15 = vector.shape_cast %14 : vector<2xf32> to vector<2x1xf32>
    %16 = arith.addf %13, %15 : vector<2x1xf32>
    %c0_12 = arith.constant 0 : index
    %c0_13 = arith.constant 0 : index
    %17 = vector.load %arg11[%c0_12, %c0_13] : memref<2x1xf32, #tpu.memory_space<vmem>>, vector<2x1xf32>
    tpu.vector_store %arg11[%c0_12, %c0_13], %16 {strides = array<i32>} : memref<2x1xf32, #tpu.memory_space<vmem>>, vector<2x1xf32>,
    %c0_i32_14 = arith.constant 0 : i32
    %18 = arith.cmpi eq, %arg1, %c0_i32_14 : i32
    %19 = arith.extui %18 : i1 to i32
    %c0_i32_15 = arith.constant 0 : i32
    %20 = arith.cmpi ne, %19, %c0_i32_15 : i32
    scf.if %20 {
      %c0_16 = arith.constant 0 : index
      %c0_17 = arith.constant 0 : index
      %21 = vector.load %arg7[%c0_16, %c0_17] : memref<5x128xf32, #tpu.memory_space<vmem>>, vector<1x32xf32>
      %c1 = arith.constant 1 : index
      %c0_18 = arith.constant 0 : index
      %22 = vector.load %arg7[%c1, %c0_18] : memref<5x128xf32, #tpu.memory_space<vmem>>, vector<1x32xf32>
      %c2 = arith.constant 2 : index
      %c0_19 = arith.constant 0 : index
      %23 = vector.load %arg7[%c2, %c0_19] : memref<5x128xf32, #tpu.memory_space<vmem>>, vector<1x32xf32>
      %c3 = arith.constant 3 : index
      %c0_20 = arith.constant 0 : index
      %24 = vector.load %arg7[%c3, %c0_20] : memref<5x128xf32, #tpu.memory_space<vmem>>, vector<1x32xf32>
      %c4 = arith.constant 4 : index
      %c0_21 = arith.constant 0 : index
      %25 = vector.load %arg7[%c4, %c0_21] : memref<5x128xf32, #tpu.memory_space<vmem>>, vector<1x128xf32>
      %c0_22 = arith.constant 0 : index
      %c0_23 = arith.constant 0 : index
      %26 = vector.load %arg10[%c0_22, %c0_23] : memref<2x32xf32, #tpu.memory_space<vmem>>, vector<2x32xf32>
      %c0_24 = arith.constant 0 : index
      %c0_25 = arith.constant 0 : index
      %27 = vector.load %arg11[%c0_24, %c0_25] : memref<2x1xf32, #tpu.memory_space<vmem>>, vector<2x1xf32>
      %cst_26 = arith.constant 9.99999971E-10 : f32
      %28 = vector.broadcast %cst_26 : f32 to vector<2x1xf32>
      %29 = arith.maximumf %27, %28 : vector<2x1xf32>
      %30 = vector.broadcast %29 : vector<2x1xf32> to vector<2x32xf32>
      %31 = arith.divf %26, %30 : vector<2x32xf32>
      %c0_27 = arith.constant 0 : index
      %c0_28 = arith.constant 0 : index
      %32 = vector.load %arg4[%c0_27, %c0_28] : memref<32x32xf32, #tpu.memory_space<vmem>>, vector<32x32xf32>
      %cst_29 = arith.constant dense<0.000000e+00> : vector<2x32xf32>
      %33 = tpu.matmul %31, %32, %cst_29 {dimension_numbers = #tpu.dot_dimension_numbers<[1], [0], [0], [1], [0, 0, 1, 1], [], []>} : vector<2x32xf32>, vector<32x32xf32>, vector<2x32xf32> -> vector<2x32xf32>
      %34 = vector.broadcast %21 : vector<1x32xf32> to vector<2x32xf32>
      %35 = arith.addf %33, %34 : vector<2x32xf32>
      %cst_30 = arith.constant dense<0.000000e+00> : vector<2xf32>
      %36 = vector.multi_reduction <add>, %35, %cst_30 [1] : vector<2x32xf32> to vector<2xf32>
      %37 = vector.shape_cast %36 : vector<2xf32> to vector<2x1xf32>
      %cst_31 = arith.constant 3.200000e+01 : f32
      %38 = vector.broadcast %cst_31 : f32 to vector<2x1xf32>
      %39 = arith.divf %37, %38 : vector<2x1xf32>
      %40 = vector.broadcast %39 : vector<2x1xf32> to vector<2x32xf32>
      %41 = arith.subf %35, %40 : vector<2x32xf32>
      %42 = vector.broadcast %39 : vector<2x1xf32> to vector<2x32xf32>
      %43 = arith.subf %35, %42 : vector<2x32xf32>
      %44 = arith.mulf %41, %43 : vector<2x32xf32>
      %cst_32 = arith.constant dense<0.000000e+00> : vector<2xf32>
      %45 = vector.multi_reduction <add>, %44, %cst_32 [1] : vector<2x32xf32> to vector<2xf32>
      %46 = vector.shape_cast %45 : vector<2xf32> to vector<2x1xf32>
      %cst_33 = arith.constant 3.200000e+01 : f32
      %47 = vector.broadcast %cst_33 : f32 to vector<2x1xf32>
      %48 = arith.divf %46, %47 : vector<2x1xf32>
      %49 = vector.broadcast %39 : vector<2x1xf32> to vector<2x32xf32>
      %50 = arith.subf %35, %49 : vector<2x32xf32>
      %cst_34 = arith.constant 9.99999974E-6 : f32
      %51 = vector.broadcast %cst_34 : f32 to vector<2x1xf32>
      %52 = arith.addf %48, %51 : vector<2x1xf32>
      %53 = math.rsqrt %52 : vector<2x1xf32>
      %54 = vector.broadcast %53 : vector<2x1xf32> to vector<2x32xf32>
      %55 = arith.mulf %50, %54 : vector<2x32xf32>
      %56 = vector.broadcast %22 : vector<1x32xf32> to vector<2x32xf32>
      %57 = arith.mulf %55, %56 : vector<2x32xf32>
      %58 = vector.broadcast %23 : vector<1x32xf32> to vector<2x32xf32>
      %59 = arith.addf %57, %58 : vector<2x32xf32>
      %60 = arith.mulf %59, %59 : vector<2x32xf32>
      %cst_35 = arith.constant dense<0.000000e+00> : vector<2xf32>
      %61 = vector.multi_reduction <add>, %60, %cst_35 [1] : vector<2x32xf32> to vector<2xf32>
      %62 = vector.shape_cast %61 : vector<2xf32> to vector<2x1xf32>
      %63 = math.sqrt %62 : vector<2x1xf32>
      %cst_36 = arith.constant 9.99999996E-13 : f32
      %64 = vector.broadcast %cst_36 : f32 to vector<2x1xf32>
      %65 = arith.maximumf %63, %64 : vector<2x1xf32>
      %66 = vector.broadcast %65 : vector<2x1xf32> to vector<2x32xf32>
      %67 = arith.divf %59, %66 : vector<2x32xf32>
      %c0_37 = arith.constant 0 : index
      %c0_38 = arith.constant 0 : index
      %68 = vector.load %arg8[%c0_37, %c0_38] : memref<2x32xf32, #tpu.memory_space<vmem>>, vector<2x32xf32>
      tpu.vector_store %arg8[%c0_37, %c0_38], %67 {strides = array<i32>} : memref<2x32xf32, #tpu.memory_space<vmem>>, vector<2x32xf32>,
      %c0_39 = arith.constant 0 : index
      %c0_40 = arith.constant 0 : index
      %69 = vector.load %arg5[%c0_39, %c0_40] : memref<32x32xf32, #tpu.memory_space<vmem>>, vector<32x32xf32>
      %cst_41 = arith.constant dense<0.000000e+00> : vector<2x32xf32>
      %70 = tpu.matmul %67, %69, %cst_41 {dimension_numbers = #tpu.dot_dimension_numbers<[1], [0], [0], [1], [0, 0, 1, 1], [], []>} : vector<2x32xf32>, vector<32x32xf32>, vector<2x32xf32> -> vector<2x32xf32>
      %71 = vector.broadcast %24 : vector<1x32xf32> to vector<2x32xf32>
      %72 = arith.addf %70, %71 : vector<2x32xf32>
      %cst_42 = arith.constant 0.000000e+00 : f32
      %73 = vector.broadcast %cst_42 : f32 to vector<2x32xf32>
      %74 = arith.maximumf %72, %73 : vector<2x32xf32>
      %c0_43 = arith.constant 0 : index
      %c0_44 = arith.constant 0 : index
      %75 = vector.load %arg6[%c0_43, %c0_44] : memref<32x128xf32, #tpu.memory_space<vmem>>, vector<32x128xf32>
      %cst_45 = arith.constant dense<0.000000e+00> : vector<2x128xf32>
      %76 = tpu.matmul %74, %75, %cst_45 {dimension_numbers = #tpu.dot_dimension_numbers<[1], [0], [0], [1], [0, 0, 1, 1], [], []>} : vector<2x32xf32>, vector<32x128xf32>, vector<2x128xf32> -> vector<2x128xf32>
      %77 = vector.broadcast %25 : vector<1x128xf32> to vector<2x128xf32>
      %78 = arith.addf %76, %77 : vector<2x128xf32>
      %c0_46 = arith.constant 0 : index
      %c0_47 = arith.constant 0 : index
      %79 = vector.load %arg9[%c0_46, %c0_47] : memref<2x128xf32, #tpu.memory_space<vmem>>, vector<2x128xf32>
      tpu.vector_store %arg9[%c0_46, %c0_47], %78 {strides = array<i32>} : memref<2x128xf32, #tpu.memory_space<vmem>>, vector<2x128xf32>,
    } else {
    }
    return
  }
  func.func @transform_0(%arg0: i32, %arg1: i32) -> (i32, i32, i32) {
    %c0_i32 = arith.constant 0 : i32
    %c0_i32_0 = arith.constant 0 : i32
    return %arg0, %arg1, %c0_i32 : i32, i32, i32
  }
  func.func @transform_1(%arg0: i32, %arg1: i32) -> (i32, i32) {
    %c0_i32 = arith.constant 0 : i32
    return %arg0, %arg1 : i32, i32
  }
  func.func @transform_2(%arg0: i32, %arg1: i32) -> (i32, i32) {
    %c0_i32 = arith.constant 0 : i32
    %c0_i32_0 = arith.constant 0 : i32
    %c0_i32_1 = arith.constant 0 : i32
    return %c0_i32, %c0_i32_0 : i32, i32
  }
  func.func @transform_3(%arg0: i32, %arg1: i32) -> (i32, i32) {
    %c0_i32 = arith.constant 0 : i32
    %c0_i32_0 = arith.constant 0 : i32
    %c0_i32_1 = arith.constant 0 : i32
    return %c0_i32, %c0_i32_0 : i32, i32
  }
  func.func @transform_4(%arg0: i32, %arg1: i32) -> (i32, i32) {
    %c0_i32 = arith.constant 0 : i32
    %c0_i32_0 = arith.constant 0 : i32
    %c0_i32_1 = arith.constant 0 : i32
    return %c0_i32, %c0_i32_0 : i32, i32
  }
  func.func @transform_5(%arg0: i32, %arg1: i32) -> (i32, i32) {
    %c0_i32 = arith.constant 0 : i32
    %c0_i32_0 = arith.constant 0 : i32
    %c0_i32_1 = arith.constant 0 : i32
    return %c0_i32, %c0_i32_0 : i32, i32
  }
  func.func @transform_6(%arg0: i32, %arg1: i32) -> (i32, i32) {
    %c0_i32 = arith.constant 0 : i32
    %c0_i32_0 = arith.constant 0 : i32
    return %arg0, %c0_i32 : i32, i32
  }
  func.func @transform_7(%arg0: i32, %arg1: i32) -> (i32, i32) {
    %c0_i32 = arith.constant 0 : i32
    %c0_i32_0 = arith.constant 0 : i32
    return %arg0, %c0_i32 : i32, i32
  }
}

</mosaic_0001>

<bundles_post_ra>
// kernel: tpu_custom_call.1
= control target key start
LH: loop header
LB: loop body
LE: loop exit
PB: predicated region body
PF: predicated region fallthrough
CT: control target
= control target key end

     0   :  { %13 = vsyncpa [#allocation5], 0  ;;  %s734_s0 = inlined_call_operand.hbm [shape: bf16[2,8,32], index: 0, kind: input, shape index: {}]   ;;  %s735_s1 = inlined_call_operand.hbm [shape: f32[2,8], index: 1, kind: input, shape index: {}]   ;;  %s736_s2 = inlined_call_operand.hbm [shape: f32[32,32], index: 2, kind: input, shape index: {}]   ;;  %s737_s3 = inlined_call_operand.hbm [shape: f32[32,32], index: 3, kind: input, shape index: {}]   ;;  %s738_s4 = inlined_call_operand.hbm [shape: f32[32,128], index: 4, kind: input, shape index: {}]   ;;  %s739_s5 = inlined_call_operand.hbm [shape: f32[5,128], index: 5, kind: input, shape index: {}]   ;;  %s740_s6 = inlined_call_operand.hbm [shape: f32[2,32], index: 6, kind: output, shape index: {0}]   ;;  %s741_s7 = inlined_call_operand.hbm [shape: f32[2,128], index: 7, kind: output, shape index: {1}]  }
   0x1   :  { %14 = vsyncpa [#allocation8], 0 }
   0x2   :  { %15 = vsyncpa [#allocation11], 0 }
   0x3   :  { %16 = vsyncpa [#allocation14], 0 }
   0x4   :  { %17 = vsyncpa [#allocation6], 0  ;;  %s37_s26 = sshll.u32 %s735_s1, 4  ;;  %s38_s26 = int_to_ptr.hbm [resolvable:$true] %s37_s26 }
   0x5   :  { %18 = vsyncpa [#allocation17], 0  ;;  %s642_s27 = smov [#allocation7]   ;;  %s60_s8 = sshll.u32 %s737_s3, 4  ;;  %s61_s8 = int_to_ptr.hbm [resolvable:$true] %s60_s8 }
   0x6   :  { %s39_s28 = sshll.u32 %s642_s27, 4  ;;  %s643_s9 = smov [#allocation10]   ;;  %s40_s28 = int_to_ptr.vmem [resolvable:$true] %s39_s28 }
   0x7   :  { %42 = dma.hbm_to_vmem [thread:$0]  %s38_s26, 32, %s40_s28, [#allocation8]  }
   0x8   :  { %s62_s10 = sshll.u32 %s643_s9, 4  ;;  %s23_s13 = sshll.u32 %s734_s0, 4  ;;  %s63_s10 = int_to_ptr.vmem [resolvable:$true] %s62_s10  ;;  %s24_s13 = int_to_ptr.hbm [resolvable:$true] %s23_s13 }
   0x9   :  { %s644_s1 = smov 128   ;;  %s645_s14 = smov 8  }
   0xa   :  { %68 = dma.hbm_to_vmem [thread:$0]  %s61_s8, 512, %s63_s10, [#allocation11], %s644_s1, %s644_s1, %s645_s14  }
   0xb   :  { %s646_s15 = smov [#allocation4]   ;;  %s47_s19 = sshll.u32 %s736_s2, 4  ;;  %s48_s19 = int_to_ptr.hbm [resolvable:$true] %s47_s19 }
   0xc   :  { %s25_s16 = sshll.u32 %s646_s15, 4  ;;  %s647_s3 = smov 64   ;;  %s26_s16 = int_to_ptr.vmem [resolvable:$true] %s25_s16 }
   0xd   :  { %s648_s20 = smov 4   ;;  %s649_s21 = smov [#allocation9]  }
   0xe   :  { %31 = dma.hbm_to_vmem [thread:$0]  %s24_s13, 128, %s26_s16, [#allocation5], %s647_s3, %s647_s3, %s648_s20  }
   0xf   :  { %s49_s22 = sshll.u32 %s649_s21, 4  ;;  %s73_s24 = sshll.u32 %s738_s4, 4  ;;  %s50_s22 = int_to_ptr.vmem [resolvable:$true] %s49_s22  ;;  %s74_s24 = int_to_ptr.hbm [resolvable:$true] %s73_s24 }
  0x10   :  { %55 = dma.hbm_to_vmem [thread:$0]  %s48_s19, 512, %s50_s22, [#allocation8], %s644_s1, %s644_s1, %s645_s14  }
  0x11   :  { %s87_s27 = sshll.u32 %s739_s5, 4  ;;  %s650_s28 = smov [#allocation12]   ;;  %s88_s27 = int_to_ptr.hbm [resolvable:$true] %s87_s27 }
  0x12   :  { %s75_s29 = sshll.u32 %s650_s28, 4  ;;  %s651_s2 = smov [#allocation13]   ;;  %s76_s29 = int_to_ptr.vmem [resolvable:$true] %s75_s29 }
  0x13   :  { %81 = dma.hbm_to_vmem [thread:$0]  %s74_s24, 512, %s76_s29, [#allocation11], %s644_s1, %s644_s1, %s645_s14  }
  0x14   :  { %s89_s30 = sshll.u32 %s651_s2, 4  ;;  %s90_s30 = int_to_ptr.vmem [resolvable:$true] %s89_s30 }
  0x15   :  { %92 = dma.hbm_to_vmem [thread:$0]  %s88_s27, 128, %s90_s30, [#allocation14]  }
  0x16   :  { %630 = dma.done.wait [#allocation5], 128  }
  0x17   :  { %631 = vsyncadd [#allocation5], 4294967168 }
  0x18   :  { %632 = dma.done.wait [#allocation8], 544  }
  0x19   :  { %633 = vsyncadd [#allocation8], 4294966752 }
  0x1a   :  { %634 = dma.done.wait [#allocation11], 1024  }
  0x1b   :  { %635 = vsyncadd [#allocation11], 4294966272 }
  0x1c   :  { %636 = dma.done.wait [#allocation14], 128  }
  0x1d   :  { %637 = vsyncadd [#allocation14], 4294967168  ;;  %v132_v0 = vlaneseq  ;;  %vm121_vm0 = vcmask 254976   ;;  %vm123_vm1 = vcmask 1024   ;;  %v652_v1 = vmov 0.0   ;;  %v401_v8 = vld [vmem:[#allocation4] sm:$0xff]  }
  0x1e   :  { %122 = vst.msk [vmem:[#allocation2] sm:$0x3] %vm121_vm0, %v652_v1  ;;  %vm171_vm2 = vcmask 58368   ;;  %v129_v3 = vld [vmem:[#allocation7] sm:$0x3]  ;;  %v653_v7 = vmov 0   ;;  %v403_v11 = vunpack.c.h.bf16 %v401_v8  ;;  %v402_v20 = vunpack.c.l.bf16 %v401_v8 }
  0x1f   :  { %v133_v2 = vshrl.u32 %v132_v0, 7  ;;  %124 = vst.msk [vmem:[#allocation3] sm:$0x3] %vm123_vm1, %v652_v1  ;;  %v172_v4 = vsel %vm171_vm2, %v129_v3, 0.0  ;;  %v138_v5 = vperm.slane %v129_v3, 1  ;;  %v131_v6 = vperm.slane %v129_v3, 0 }
  0x20   :  { %173 = vadd.xlane.f32.xlu0 %v172_v4  ;;  %vm147_vm3 = vcmask 261120   ;;  %vm164_vm4 = vcmask 1041409   ;;  %v212_v37 = vld [vmem:[#allocation9 + $0x18] sm:$0xff]  ;;  %v211_v38 = vld [vmem:[#allocation9 + $0x10] sm:$0xff]  ;;  %v210_v39 = vld [vmem:[#allocation9 + $0x8] sm:$0xff]  ;;  %v654_v58 = vmov 32.0  }
  0x21   :  { %420 = vset.pattern.permute.xlu1 %v133_v2  ;;  %419 = vset.pattern.permute.xlu0 %v133_v2  ;;  %v209_v40 = vld [vmem:[#allocation9] sm:$0xff]  ;;  %s655_s4 = smov [#allocation15]   ;;  %s368_s10 = sshll.u32 %s740_s6, 4  ;;  %s369_s10 = int_to_ptr.hbm [resolvable:$true] %s368_s10 }
  0x22   :  { %229 = vmatpush.msra.mxu0 %v212_v37  ;;  %v423_v54 = vld [vmem:[#allocation13] ss:$0 sm:$0xff]  ;;  %s366_s5 = sshll.u32 %s655_s4, 4  ;;  %s656_s11 = smov [#allocation16]   ;;  %s367_s5 = int_to_ptr.vmem [resolvable:$true] %s366_s5 }
  0x23   :  { %s377_s12 = sshll.u32 %s656_s11, 4  ;;  %s379_s14 = sshll.u32 %s741_s7, 4  ;;  %s378_s12 = int_to_ptr.vmem [resolvable:$true] %s377_s12  ;;  %s380_s14 = int_to_ptr.hbm [resolvable:$true] %s379_s14 }
  0x24   :  { %230 = vmatpush.msra.mxu0 %v211_v38 }
  0x25   :  { %v130_v33 = vld [vmem:[#allocation2] sm:$0x3] }
  0x26   :  { %v170_v9 = vld [vmem:[#allocation3] sm:$0x3]  ;;  %231 = vmatpush.msra.mxu0 %v210_v39 }
  0x28   :  { %232 = vmatpush.msra.mxu0 %v209_v40 }
  0x29   :  { %143 = vperm.xlu1 %420, %v138_v5  }
  0x31   :  { %421 = vset.pattern.permute.xlu1 %v653_v7 }
  0x34   :  { %136 = vperm.xlu0 %419, %v131_v6  }
  0x3c   :  { %422 = vset.pattern.permute.xlu0 %v653_v7 }
  0x93   :  { %v174_v10 = vpop.xlane.xlu0 %173 }
  0x94   :  { %v175_v12 = vadd.f32 %v174_v10, %v170_v9 }
  0x96   :  { %177 = vst.msk [vmem:[#allocation3] sm:$0x3] %vm123_vm1, %v175_v12 }
  0x9b   :  { %v144_v13 = vpop.permute.xlu1 %143 }
  0x9c   :  { %v146_v14 = vmul.f32 %v403_v11, %v144_v13 }
  0x9d   :  { %v187_v16 = vld [vmem:[#allocation3] sm:$0x3] }
  0x9e   :  { %v155_v15 = vsel %vm147_vm3, %v146_v14, 0.0  ;;  %v188_v17 = vmax.f32 %v187_v16, 1e-09 }
  0x9f   :  { %v156_v18 = vrot.slane %v155_v15, 4 }
  0xa0   :  { %191 = vperm.xlu1 %421, %v188_v17  }
  0xa1   :  { %v157_v19 = vadd.f32 %v156_v18, %v155_v15  ;;  %v424_v15 = vld [vmem:[#allocation13 + $0x1] ss:$0 sm:$0xff]  ;;  %v425_v18 = vld [vmem:[#allocation13 + $0x2] ss:$0 sm:$0xff] }
  0xa3   :  { %v158_v21 = vrot.slane %v157_v19, 2 }
  0xa5   :  { %v159_v25 = vadd.f32 %v158_v21, %v157_v19 }
  0xa6   :  { %v137_v22 = vpop.permute.xlu0 %136 }
  0xa7   :  { %v145_v23 = vmul.f32 %v402_v20, %v137_v22  ;;  %v160_v28 = vrot.slane %v159_v25, 1 }
  0xa9   :  { %v148_v24 = vsel %vm147_vm3, %v145_v23, 0.0  ;;  %v161_v31 = vadd.f32 %v160_v28, %v159_v25  ;;  %v306_v23 = vld [vmem:[#allocation10 + $0x18] sm:$0xff]  ;;  %v304_v25 = vld [vmem:[#allocation10 + $0x8] sm:$0xff] }
  0xaa   :  { %v149_v26 = vrot.slane %v148_v24, 4  ;;  %323 = vmatpush.msra.mxu1 %v306_v23 }
  0xac   :  { %v150_v27 = vadd.f32 %v149_v26, %v148_v24  ;;  %v305_v24 = vld [vmem:[#allocation10 + $0x10] sm:$0xff]  ;;  %v303_v26 = vld [vmem:[#allocation10] sm:$0xff] }
  0xad   :  { %324 = vmatpush.msra.mxu1 %v305_v24 }
  0xae   :  { %v151_v29 = vrot.slane %v150_v27, 2 }
  0xaf   :  { %325 = vmatpush.msra.mxu1 %v304_v25 }
  0xb0   :  { %v152_v30 = vadd.f32 %v151_v29, %v150_v27 }
  0xb1   :  { %326 = vmatpush.msra.mxu1 %v303_v26 }
  0xb2   :  { %v153_v32 = vrot.slane %v152_v30, 1 }
  0xb4   :  { %v154_v34 = vadd.f32 %v153_v32, %v152_v30 }
  0xb6   :  { %v165_v35 = vsel %vm164_vm4, %v161_v31, %v154_v34  ;;  %v335_v31 = vld [vmem:[#allocation12 + $0x18] sm:$0xff] }
  0xb7   :  { %v167_v36 = vadd.f32 %v165_v35, %v130_v33  ;;  %352 = vmatpush.msra.mxu2 %v335_v31 }
  0xb9   :  { %169 = vst.msk [vmem:[#allocation2] sm:$0x3] %vm121_vm0, %v167_v36 }
  0xc0   :  { %v186_v51 = vld [vmem:[#allocation2] sm:$0x3] }
 0x112   :  { %v192_v41 = vpop.permute.xlu1 %191 }
 0x113   :  { %428 = vrcp.f32 %v192_v41  ;;  %v205_v45 = vand.u32 2147483648, %v192_v41  ;;  %v203_v47 = vand.u32 2147483647, %v192_v41  ;;  %vm199_vm6 = vweird.f32 %v192_v41 }
 0x114   :  { %430 = vrcp.f32 %v654_v58  ;;  %v427_v58 = vld [vmem:[#allocation13 + $0x4] ss:$0 sm:$0xff] }
 0x115   :  { %v206_v49 = vor.u32 1.1754944e-38, %v205_v45  ;;  %vm204_vm8 = vcmp.eq.f32.partialorder %v203_v47, 8.507059e+37 }
 0x119   :  { %v429_v42 = vpop.eup %428 }
 0x11a   :  { %v195_v43 = vmul.f32 %v429_v42, %v192_v41  ;;  %vm200_vm5 = vweird.f32 %v429_v42  ;;  %v431_v59 = vpop.eup %430 }
 0x11b   :  { %vm201_vm7 = vmor %vm199_vm6, %vm200_vm5  ;;  %v241_v60 = vmul.f32 32.0, %v431_v59  ;;  %vm245_vm9 = vweird.f32 %v431_v59 }
 0x11c   :  { %v196_v44 = vsub.f32 1.0, %v195_v43 }
 0x11d   :  { %v242_v61 = vsub.f32 1.0, %v241_v60 }
 0x11e   :  { %v197_v46 = vmul.f32 %v429_v42, %v196_v44 }
 0x11f   :  { %v243_v62 = vmul.f32 %v431_v59, %v242_v61 }
 0x120   :  { %v198_v48 = vadd.f32 %v429_v42, %v197_v46 }
 0x121   :  { %v244_v63 = vadd.f32 %v431_v59, %v243_v62 }
 0x122   :  { %v202_v50 = vsel %vm201_vm7, %v429_v42, %v198_v48 }
 0x123   :  { %v207_v52 = vsel %vm204_vm8, %v206_v49, %v202_v50  ;;  %v246_v0 = vsel %vm245_vm9, %v431_v59, %v244_v63 }
 0x124   :  { %v208_v53 = vmul.f32 %v207_v52, %v186_v51  ;;  %v334_v51 = vld [vmem:[#allocation12 + $0x10] sm:$0xff]  ;;  %v333_v52 = vld [vmem:[#allocation12 + $0x8] sm:$0xff] }
 0x125   :  { %353 = vmatpush.msra.mxu2 %v334_v51 }
 0x126   :  { %397 = vmatmul.msk.f32.vlgmr.msra.gmra.mxu0 %vm147_vm3, %v208_v53  ;;  %v332_v53 = vld [vmem:[#allocation12] sm:$0xff] }
 0x127   :  { %354 = vmatpush.msra.mxu2 %v333_v52 }
 0x129   :  { %355 = vmatpush.msra.mxu2 %v332_v53 }
 0x1a3   :  { %v234_v55 = vpop.f32.mrf.mxu0 }
 0x1a4   :  { %v235_v56 = vadd.f32 %v423_v54, %v234_v55  ;;  %v426_v54 = vld [vmem:[#allocation13 + $0x3] ss:$0 sm:$0xff] }
 0x1a6   :  { %v237_v57 = vsel %vm121_vm0, %v235_v56, 0.0 }
 0x1a7   :  { %238 = vadd.xlane.f32.xlu2 %v237_v57 }
 0x21a   :  { %v239_v1 = vpop.xlane.xlu2 %238 }
 0x21b   :  { %v247_v2 = vmul.f32 %v246_v0, %v239_v1 }
 0x21d   :  { %v248_v3 = vsub.f32 %v235_v56, %v247_v2 }
 0x21f   :  { %v249_v4 = vmul.f32 %v248_v3, %v248_v3 }
 0x221   :  { %v250_v5 = vsel %vm121_vm0, %v249_v4, 0.0 }
 0x222   :  { %251 = vadd.xlane.f32.xlu2 %v250_v5 }
 0x295   :  { %v252_v6 = vpop.xlane.xlu2 %251 }
 0x296   :  { %v253_v7 = vmul.f32 %v252_v6, %v246_v0 }
 0x298   :  { %v254_v8 = vadd.f32 1e-05, %v253_v7 }
 0x29a   :  { %432 = vrsqrt.f32 %v254_v8  ;;  %vm261_vm11 = vweird.f32 %v254_v8 }
 0x2a0   :  { %v433_v9 = vpop.eup %432 }
 0x2a1   :  { %v256_v10 = vmul.f32 %v433_v9, %v254_v8  ;;  %vm262_vm10 = vweird.f32 %v433_v9 }
 0x2a2   :  { %vm263_vm12 = vmor %vm261_vm11, %vm262_vm10 }
 0x2a3   :  { %v257_v11 = vmul.f32 %v433_v9, %v256_v10 }
 0x2a5   :  { %v258_v12 = vmul.f32 0.5, %v257_v11 }
 0x2a7   :  { %v259_v13 = vsub.f32 1.5, %v258_v12 }
 0x2a9   :  { %v260_v14 = vmul.f32 %v433_v9, %v259_v13 }
 0x2ab   :  { %v264_v16 = vsel %vm263_vm12, %v433_v9, %v260_v14 }
 0x2ac   :  { %v265_v17 = vmul.f32 %v264_v16, %v248_v3 }
 0x2ae   :  { %v267_v19 = vmul.f32 %v424_v15, %v265_v17 }
 0x2b0   :  { %v269_v20 = vadd.f32 %v425_v18, %v267_v19 }
 0x2b2   :  { %v270_v21 = vmul.f32 %v269_v20, %v269_v20 }
 0x2b4   :  { %v271_v22 = vsel %vm121_vm0, %v270_v21, 0.0 }
 0x2b5   :  { %272 = vadd.xlane.f32.xlu1 %v271_v22 }
 0x328   :  { %v273_v27 = vpop.xlane.xlu1 %272 }
 0x329   :  { %434 = vrsqrt.f32 %v273_v27  ;;  %vm281_vm13 = vcmp.eq.f32.partialorder %v273_v27, inf  ;;  %v284_v36 = vand.u32 2147483648, %v273_v27  ;;  %vm283_vm14 = vcmp.eq.f32.partialorder %v273_v27, 0.0 }
 0x32f   :  { %v435_v28 = vpop.eup %434 }
 0x330   :  { %v275_v29 = vmul.f32 %v435_v28, %v273_v27 }
 0x332   :  { %v276_v30 = vmul.f32 %v435_v28, %v275_v29 }
 0x334   :  { %v277_v32 = vmul.f32 0.5, %v276_v30 }
 0x336   :  { %v278_v33 = vsub.f32 1.5, %v277_v32 }
 0x338   :  { %v279_v34 = vmul.f32 %v435_v28, %v278_v33 }
 0x33a   :  { %v280_v35 = vmul.f32 %v279_v34, %v273_v27 }
 0x33c   :  { %v282_v37 = vsel %vm281_vm13, %v273_v27, %v280_v35 }
 0x33d   :  { %v285_v38 = vsel %vm283_vm14, %v284_v36, %v282_v37 }
 0x33e   :  { %v286_v39 = vmax.f32 %v285_v38, 1e-12 }
 0x340   :  { %436 = vrcp.f32 %v286_v39  ;;  %v298_v43 = vand.u32 2147483648, %v286_v39  ;;  %v296_v45 = vand.u32 2147483647, %v286_v39  ;;  %vm292_vm1 = vweird.f32 %v286_v39 }
 0x342   :  { %v299_v47 = vor.u32 1.1754944e-38, %v298_v43  ;;  %vm297_vm4 = vcmp.eq.f32.partialorder %v296_v45, 8.507059e+37 }
 0x346   :  { %v437_v40 = vpop.eup %436 }
 0x347   :  { %v288_v41 = vmul.f32 %v437_v40, %v286_v39  ;;  %vm293_vm15 = vweird.f32 %v437_v40 }
 0x348   :  { %vm294_vm2 = vmor %vm292_vm1, %vm293_vm15 }
 0x349   :  { %v289_v42 = vsub.f32 1.0, %v288_v41 }
 0x34b   :  { %v290_v44 = vmul.f32 %v437_v40, %v289_v42 }
 0x34d   :  { %v291_v46 = vadd.f32 %v437_v40, %v290_v44 }
 0x34f   :  { %v295_v48 = vsel %vm294_vm2, %v437_v40, %v291_v46 }
 0x350   :  { %v300_v49 = vsel %vm297_vm4, %v299_v47, %v295_v48 }
 0x351   :  { %v301_v50 = vmul.f32 %v300_v49, %v269_v20 }
 0x353   :  { %398 = vmatmul.msk.f32.vlgmr.msra.gmra.mxu1 %vm147_vm3, %v301_v50  ;;  %302 = vst.msk [vmem:[#allocation15] sm:$0x3] %vm121_vm0, %v301_v50 }
 0x354   :  { %371 = dma.vmem_to_hbm [thread:$0]  %s367_s5, 32, %s369_s10, [#allocation6]  }
 0x3d0   :  { %v328_v55 = vpop.f32.mrf.mxu1 }
 0x3d1   :  { %v329_v56 = vadd.f32 %v426_v54, %v328_v55 }
 0x3d3   :  { %v331_v57 = vmax.f32 %v329_v56, 0.0 }
 0x3d5   :  { %399 = vmatmul.msk.f32.vlgmr.msra.gmra.mxu2 %vm147_vm3, %v331_v57 }
 0x458   :  { %v357_v59 = vpop.f32.mrf.mxu2 }
 0x459   :  { %v358_v60 = vadd.f32 %v427_v58, %v357_v59 }
 0x45b   :  { %360 = vst [vmem:[#allocation16] sm:$0x3] %v358_v60 }
 0x45c   :  { %382 = dma.vmem_to_hbm [thread:$0]  %s378_s12, 32, %s380_s14, [#allocation17]  }
 0x45d   :  { %638 = dma.done.wait [#allocation6], 32  }
 0x45e   :  { %639 = vsyncadd [#allocation6], 4294967264 }
 0x45f   :  { %640 = dma.done.wait [#allocation17], 32  }
 0x460   :  { %641 = vsyncadd [#allocation17], 4294967264 }
 0x461   :  { %391 = vsyncpa [#allocation5], 1 }
 0x462   :  { %392 = vsyncpa [#allocation8], 1 }
 0x463   :  { %393 = vsyncpa [#allocation11], 1 }
 0x464   :  { %394 = vsyncpa [#allocation14], 1 }
 0x465   :  { %395 = vsyncpa [#allocation6], 1 }
 0x466   :  { %396 = vsyncpa [#allocation17], 1 }

</bundles_post_ra>
